<compile_context>
chip_gen: v7x
topology: tpu7x:2x2x1
jax: 0.10.0
libtpu: 0.0.40
codegen_flags: <defaults>
</compile_context>

<pallas_src>
import functools

import numpy as np
import jax
import jax.numpy as jnp
from jax.experimental import pallas as pl
from jax.experimental.pallas import tpu as pltpu


def _round_up(x, m):
    return ((x + m - 1) // m) * m


def _choose_m_tiles(M):
    if M >= 256:
        return 256, _round_up(M, 256)
    bm = _round_up(max(M, 16), 16)
    return bm, bm


def _choose_pool_m_tiles(M):
    if M >= 256:
        return 256, _round_up(M, 256)
    bm = _round_up(max(M, 8), 8)
    return bm, bm


def _choose_c_tiles(C):
    Cp = _round_up(C, 128)
    bc = 256 if Cp % 256 == 0 else 128
    return bc, Cp


# ----------------------------------------------------------------------------
# Pallas kernels
# ----------------------------------------------------------------------------
def _mm_kernel(relu, a_ref, b_ref, s_ref, c_ref, o_ref):
    # a: (bm, K) bf16   b: (K, bn) bf16   s/c: (1, bn) f32   o: (bm, bn) f32
    acc = jnp.dot(a_ref[...], b_ref[...], preferred_element_type=jnp.float32)
    y = acc * s_ref[...] + c_ref[...]
    if relu:
        y = jnp.maximum(y, 0.0)
    o_ref[...] = y


def _pool_kernel(op, kk, x_ref, o_ref):
    # x: (kk, bm, bc) stacked pooling windows; reduce over leading axis.
    x = x_ref[...]
    if op == "max":
        o_ref[...] = jnp.max(x, axis=0)
    else:  # mean, count_include_pad=True semantics (divide by kk)
        o_ref[...] = jnp.sum(x, axis=0) * (1.0 / kk)


def _gap_kernel(hw, x_ref, o_ref):
    # x: (B, HW, bc) -> o: (B, bc)
    o_ref[...] = jnp.sum(x_ref[...], axis=1) * (1.0 / hw)


# ----------------------------------------------------------------------------
# Cached pallas_call builders (same shapes reuse the same compiled kernel)
# ----------------------------------------------------------------------------
@functools.lru_cache(maxsize=None)
def _get_matmul_call(Mp, K, Np, bm, bn, relu):
    grid = (Mp // bm, Np // bn)
    flops = 2 * Mp * K * Np
    bytes_accessed = Mp * K * 2 + K * Np * 2 + Mp * Np * 4 + 2 * Np * 4
    ce = pl.CostEstimate(flops=flops, transcendentals=0,
                         bytes_accessed=bytes_accessed)
    return pl.pallas_call(
        functools.partial(_mm_kernel, relu),
        out_shape=jax.ShapeDtypeStruct((Mp, Np), jnp.float32),
        grid=grid,
        in_specs=[
            pl.BlockSpec((bm, K), lambda i, j: (i, 0)),
            pl.BlockSpec((K, bn), lambda i, j: (0, j)),
            pl.BlockSpec((1, bn), lambda i, j: (0, j)),
            pl.BlockSpec((1, bn), lambda i, j: (0, j)),
        ],
        out_specs=pl.BlockSpec((bm, bn), lambda i, j: (i, j)),
        compiler_params=pltpu.CompilerParams(
            dimension_semantics=("parallel", "parallel"),
            vmem_limit_bytes=32 * 1024 * 1024),
        cost_estimate=ce,
    )


@functools.lru_cache(maxsize=None)
def _get_pool_call(kk, Mp, Cp, bm, bc, op):
    grid = (Mp // bm, Cp // bc)
    return pl.pallas_call(
        functools.partial(_pool_kernel, op, kk),
        out_shape=jax.ShapeDtypeStruct((Mp, Cp), jnp.float32),
        grid=grid,
        in_specs=[pl.BlockSpec((kk, bm, bc), lambda i, j: (0, i, j))],
        out_specs=pl.BlockSpec((bm, bc), lambda i, j: (i, j)),
        compiler_params=pltpu.CompilerParams(
            dimension_semantics=("parallel", "parallel")),
    )


@functools.lru_cache(maxsize=None)
def _get_gap_call(B, HW, Cp, bc):
    grid = (Cp // bc,)
    return pl.pallas_call(
        functools.partial(_gap_kernel, HW),
        out_shape=jax.ShapeDtypeStruct((B, Cp), jnp.float32),
        grid=grid,
        in_specs=[pl.BlockSpec((B, HW, bc), lambda j: (0, 0, j))],
        out_specs=pl.BlockSpec((B, bc), lambda j: (0, j)),
        compiler_params=pltpu.CompilerParams(
            dimension_semantics=("parallel",)),
    )


# ----------------------------------------------------------------------------
# JAX-side wrappers around the kernels
# ----------------------------------------------------------------------------
def _extract_patches(x, kh, kw, sh, sw, ph, pw):
    """im2col: NHWC -> (B, OH, OW, kh*kw*C)."""
    # TODO(synk): gather the taps inside the matmul kernel (K grid axis over
    # taps with shifted-window index_maps) instead of materializing kh*kw
    # shifted copies in HBM.
    xp = jnp.pad(x, ((0, 0), (ph, ph), (pw, pw), (0, 0)))
    B, H, W, C = xp.shape
    OH = (H - kh) // sh + 1
    OW = (W - kw) // sw + 1
    cols = []
    for i in range(kh):
        for j in range(kw):
            cols.append(xp[:, i:i + sh * (OH - 1) + 1:sh,
                           j:j + sw * (OW - 1) + 1:sw, :])
    return jnp.concatenate(cols, axis=-1)


def conv_bn_relu(x, p):
    """BasicConv2d: conv (no bias) + folded BatchNorm + ReLU (bf16 GEMM)."""
    xb = x.astype(jnp.bfloat16)
    if (p["kh"] == 1 and p["kw"] == 1 and p["sh"] == 1 and p["sw"] == 1
            and p["ph"] == 0 and p["pw"] == 0):
        patches = xb
    else:
        patches = _extract_patches(xb, p["kh"], p["kw"], p["sh"], p["sw"],
                                   p["ph"], p["pw"])
    B, OH, OW, K = patches.shape
    assert K == p["K"]
    M = B * OH * OW
    a = patches.reshape(M, K)
    bm, Mp = _choose_m_tiles(M)
    if Mp > M:
        a = jnp.pad(a, ((0, Mp - M), (0, 0)))
    out = _get_matmul_call(Mp, K, p["Np"], bm, p["bn"], True)(
        a, p["w"], p["scale"], p["bias"])
    return out[:M, :p["N"]].reshape(B, OH, OW, p["N"])


def _pool(x, k, stride, pad, op):
    B, H, W, C = x.shape
    xp = jnp.pad(x, ((0, 0), (pad, pad), (pad, pad), (0, 0)))
    Hp, Wp = H + 2 * pad, W + 2 * pad
    OH = (Hp - k) // stride + 1
    OW = (Wp - k) // stride + 1
    # TODO(synk): compute the 3x3 window reduction directly from the padded
    # NHWC input inside the kernel instead of stacking k*k shifted windows.
    wins = []
    for i in range(k):
        for j in range(k):
            wins.append(xp[:, i:i + stride * (OH - 1) + 1:stride,
                           j:j + stride * (OW - 1) + 1:stride, :])
    stacked = jnp.stack(wins, 0).reshape(k * k, B * OH * OW, C)
    M = B * OH * OW
    bm, Mp = _choose_pool_m_tiles(M)
    bc, Cp = _choose_c_tiles(C)
    sp = jnp.pad(stacked, ((0, 0), (0, Mp - M), (0, Cp - C)))
    out = _get_pool_call(k * k, Mp, Cp, bm, bc, op)(sp)
    return out[:M, :C].reshape(B, OH, OW, C)


def max_pool_3x3_s2(x):
    return _pool(x, 3, 2, 0, "max")


def avg_pool_3x3_s1_p1(x):
    # F.avg_pool2d default count_include_pad=True -> always divide by 9.
    return _pool(x, 3, 1, 1, "avg")


def global_avg_pool(x):
    B, H, W, C = x.shape
    bc, Cp = _choose_c_tiles(C)
    xr = x.reshape(B, H * W, C)
    if Cp > C:
        xr = jnp.pad(xr, ((0, 0), (0, 0), (0, Cp - C)))
    out = _get_gap_call(B, H * W, Cp, bc)(xr)
    return out[:, :C]


def _interp_matrix(out_size, in_size):
    """Bilinear interpolation matrix, align_corners=True."""
    if in_size == 1:
        return jnp.ones((out_size, 1), jnp.float32)
    src = np.arange(out_size) * (in_size - 1) / (out_size - 1)
    i0 = np.minimum(np.floor(src).astype(np.int64), in_size - 2)
    frac = (src - i0).astype(np.float32)
    m = np.zeros((out_size, in_size), np.float32)
    m[np.arange(out_size), i0] += 1.0 - frac
    m[np.arange(out_size), i0 + 1] += frac
    return jnp.asarray(m)


def bilinear_resize_80(x):
    """NHWC bilinear resize to 80x80 (align_corners=True); tiny -> plain JAX."""
    B, H, W, C = x.shape
    Wh = _interp_matrix(80, H)
    Ww = _interp_matrix(80, W)
    y = jnp.einsum('oh,bhwc->bowc', Wh, x)
    z = jnp.einsum('pw,bowc->bopc', Ww, y)
    return z


# ----------------------------------------------------------------------------
# Parameter construction (shapes of torchvision Inception-v3, BN folded)
# ----------------------------------------------------------------------------
def init_conv(key, cin, cout, kh, kw, stride=(1, 1), pad=(0, 0)):
    k1, k2, k3 = jax.random.split(key, 3)
    fan_in = cin * kh * kw
    w = jax.random.normal(k1, (kh, kw, cin, cout), jnp.float32) * np.sqrt(2.0 / fan_in)
    gamma = 1.0 + 0.05 * jax.random.normal(k2, (cout,), jnp.float32)
    beta = 0.05 * jax.random.normal(k3, (cout,), jnp.float32)
    run_mean = jnp.zeros((cout,), jnp.float32)
    run_var = jnp.ones((cout,), jnp.float32)
    scale = gamma / jnp.sqrt(run_var + 1e-3)   # BN eps = 0.001
    bias = beta - run_mean * scale
    return dict(w=w.reshape(kh * kw * cin, cout), scale=scale, bias=bias,
                kh=kh, kw=kw, sh=stride[0], sw=stride[1], ph=pad[0], pw=pad[1])


def fuse_convs(plist):
    """Fuse same-geometry convs that share the same input into one GEMM."""
    g = plist[0]
    w = jnp.concatenate([p["w"] for p in plist], axis=1)
    scale = jnp.concatenate([p["scale"] for p in plist], axis=0)
    bias = jnp.concatenate([p["bias"] for p in plist], axis=0)
    fused = dict(w=w, scale=scale, bias=bias, kh=g["kh"], kw=g["kw"],
                 sh=g["sh"], sw=g["sw"], ph=g["ph"], pw=g["pw"])
    return fused, tuple(int(p["w"].shape[1]) for p in plist)


def fold_input_norm(p, in_scale, in_bias):
    """Fold y = conv(s*x + b) (channelwise affine) into conv weights/bias."""
    kh, kw = p["kh"], p["kw"]
    K, N = p["w"].shape
    cin = K // (kh * kw)
    w = p["w"].reshape(kh * kw, cin, N)
    new_w = (w * in_scale.reshape(1, cin, 1)).reshape(K, N)
    extra = jnp.sum(w * in_bias.reshape(1, cin, 1), axis=(0, 1))   # (N,)
    out = dict(p)
    out["w"] = new_w
    out["bias"] = p["bias"] + p["scale"] * extra
    return out


def prepare_conv(p):
    """Pad to lane-aligned N and cast weights to bf16 ONCE (not per forward)."""
    w = p["w"]
    K, N = int(w.shape[0]), int(w.shape[1])
    bn, Np = _choose_c_tiles(N)
    wp = jnp.pad(w, ((0, 0), (0, Np - N))).astype(jnp.bfloat16)
    sp = jnp.pad(p["scale"].reshape(1, N), ((0, 0), (0, Np - N))).astype(jnp.float32)
    cp = jnp.pad(p["bias"].reshape(1, N), ((0, 0), (0, Np - N))).astype(jnp.float32)
    return dict(w=wp, scale=sp, bias=cp, N=N, Np=Np, bn=bn, K=K,
                kh=p["kh"], kw=p["kw"], sh=p["sh"], sw=p["sw"],
                ph=p["ph"], pw=p["pw"])


def prepare_tree(p):
    if isinstance(p, dict):
        if "w" in p:
            return prepare_conv(p)
        return {k: prepare_tree(v) for k, v in p.items()}
    return p


def init_inception_a(nk, cin, pool_feat):
    b1 = init_conv(nk(), cin, 64, 1, 1)
    b5_1 = init_conv(nk(), cin, 48, 1, 1)
    b5_2 = init_conv(nk(), 48, 64, 5, 5, pad=(2, 2))
    b3d_1 = init_conv(nk(), cin, 64, 1, 1)
    b3d_2 = init_conv(nk(), 64, 96, 3, 3, pad=(1, 1))
    b3d_3 = init_conv(nk(), 96, 96, 3, 3, pad=(1, 1))
    bp = init_conv(nk(), cin, pool_feat, 1, 1)
    head, splits = fuse_convs([b1, b5_1, b3d_1])
    return dict(head=head, splits=splits, b5_2=b5_2,
                b3d_2=b3d_2, b3d_3=b3d_3, bp=bp)


def init_inception_b(nk, cin):
    return dict(
        b3=init_conv(nk(), cin, 384, 3, 3, stride=(2, 2)),
        b3d_1=init_conv(nk(), cin, 64, 1, 1),
        b3d_2=init_conv(nk(), 64, 96, 3, 3, pad=(1, 1)),
        b3d_3=init_conv(nk(), 96, 96, 3, 3, stride=(2, 2)),
    )


def init_inception_c(nk, cin, c7):
    b1 = init_conv(nk(), cin, 192, 1, 1)
    b7_1 = init_conv(nk(), cin, c7, 1, 1)
    b7_2 = init_conv(nk(), c7, c7, 1, 7, pad=(0, 3))
    b7_3 = init_conv(nk(), c7, 192, 7, 1, pad=(3, 0))
    b7d_1 = init_conv(nk(), cin, c7, 1, 1)
    b7d_2 = init_conv(nk(), c7, c7, 7, 1, pad=(3, 0))
    b7d_3 = init_conv(nk(), c7, c7, 1, 7, pad=(0, 3))
    b7d_4 = init_conv(nk(), c7, c7, 7, 1, pad=(3, 0))
    b7d_5 = init_conv(nk(), c7, 192, 1, 7, pad=(0, 3))
    bp = init_conv(nk(), cin, 192, 1, 1)
    head, splits = fuse_convs([b1, b7_1, b7d_1])
    return dict(head=head, splits=splits, b7_2=b7_2, b7_3=b7_3,
                b7d_2=b7d_2, b7d_3=b7d_3, b7d_4=b7d_4, b7d_5=b7d_5, bp=bp)


def init_inception_d(nk, cin):
    b3_1 = init_conv(nk(), cin, 192, 1, 1)
    b3_2 = init_conv(nk(), 192, 320, 3, 3, stride=(2, 2))
    b7_1 = init_conv(nk(), cin, 192, 1, 1)
    b7_2 = init_conv(nk(), 192, 192, 1, 7, pad=(0, 3))
    b7_3 = init_conv(nk(), 192, 192, 7, 1, pad=(3, 0))
    b7_4 = init_conv(nk(), 192, 192, 3, 3, stride=(2, 2))
    head, splits = fuse_convs([b3_1, b7_1])
    return dict(head=head, splits=splits, b3_2=b3_2,
                b7_2=b7_2, b7_3=b7_3, b7_4=b7_4)


def init_inception_e(nk, cin):
    b1 = init_conv(nk(), cin, 320, 1, 1)
    b3_1 = init_conv(nk(), cin, 384, 1, 1)
    b3_2a = init_conv(nk(), 384, 384, 1, 3, pad=(0, 1))
    b3_2b = init_conv(nk(), 384, 384, 3, 1, pad=(1, 0))
    b3d_1 = init_conv(nk(), cin, 448, 1, 1)
    b3d_2 = init_conv(nk(), 448, 384, 3, 3, pad=(1, 1))
    b3d_3a = init_conv(nk(), 384, 384, 1, 3, pad=(0, 1))
    b3d_3b = init_conv(nk(), 384, 384, 3, 1, pad=(1, 0))
    bp = init_conv(nk(), cin, 192, 1, 1)
    head, splits = fuse_convs([b1, b3_1, b3d_1])
    return dict(head=head, splits=splits, b3_2a=b3_2a, b3_2b=b3_2b,
                b3d_2=b3d_2, b3d_3a=b3d_3a, b3d_3b=b3d_3b, bp=bp)


def build_params(key):
    keys = list(jax.random.split(key, 128))
    idx = [0]

    def nk():
        k = keys[idx[0]]
        idx[0] += 1
        return k

    P = {}
    P["Conv2d_1a_3x3"] = init_conv(nk(), 3, 32, 3, 3, stride=(2, 2))
    P["Conv2d_2a_3x3"] = init_conv(nk(), 32, 32, 3, 3)
    P["Conv2d_2b_3x3"] = init_conv(nk(), 32, 64, 3, 3, pad=(1, 1))
    P["Conv2d_3b_1x1"] = init_conv(nk(), 64, 80, 1, 1)
    P["Conv2d_4a_3x3"] = init_conv(nk(), 80, 192, 3, 3)
    P["Mixed_5b"] = init_inception_a(nk, 192, 32)
    P["Mixed_5c"] = init_inception_a(nk, 256, 64)
    P["Mixed_5d"] = init_inception_a(nk, 288, 64)
    P["Mixed_6a"] = init_inception_b(nk, 288)
    P["Mixed_6b"] = init_inception_c(nk, 768, 128)
    P["Mixed_6c"] = init_inception_c(nk, 768, 160)
    P["Mixed_6d"] = init_inception_c(nk, 768, 160)
    P["Mixed_6e"] = init_inception_c(nk, 768, 192)
    P["Mixed_7a"] = init_inception_d(nk, 768)
    P["Mixed_7b"] = init_inception_e(nk, 1280)
    P["Mixed_7c"] = init_inception_e(nk, 2048)

    # Fold ((x+1)/2 - mean)/std into Conv2d_1a (exact: affine, bilinear resize
    # with align_corners and the conv are all linear; conv1a has no padding).
    mean = jnp.array([0.485, 0.456, 0.406], jnp.float32)
    std = jnp.array([0.229, 0.224, 0.225], jnp.float32)
    P["Conv2d_1a_3x3"] = fold_input_norm(P["Conv2d_1a_3x3"],
                                         0.5 / std, (0.5 - mean) / std)
    return prepare_tree(P)


# ----------------------------------------------------------------------------
# Inception block forwards (NHWC)
# ----------------------------------------------------------------------------
def inception_a(x, p):
    head = conv_bn_relu(x, p["head"])
    s0, s1, _ = p["splits"]
    b1 = head[..., :s0]
    b5 = conv_bn_relu(head[..., s0:s0 + s1], p["b5_2"])
    b3d = head[..., s0 + s1:]
    b3 = conv_bn_relu(conv_bn_relu(b3d, p["b3d_2"]), p["b3d_3"])
    bp = conv_bn_relu(avg_pool_3x3_s1_p1(x), p["bp"])
    return jnp.concatenate([b1, b5, b3, bp], axis=-1)


def inception_b(x, p):
    b3 = conv_bn_relu(x, p["b3"])
    b3d = conv_bn_relu(conv_bn_relu(conv_bn_relu(x, p["b3d_1"]), p["b3d_2"]),
                       p["b3d_3"])
    bp = max_pool_3x3_s2(x)
    return jnp.concatenate([b3, b3d, bp], axis=-1)


def inception_c(x, p):
    head = conv_bn_relu(x, p["head"])
    s0, s1, _ = p["splits"]
    b1 = head[..., :s0]
    b7 = conv_bn_relu(conv_bn_relu(head[..., s0:s0 + s1], p["b7_2"]), p["b7_3"])
    y = head[..., s0 + s1:]
    y = conv_bn_relu(y, p["b7d_2"])
    y = conv_bn_relu(y, p["b7d_3"])
    y = conv_bn_relu(y, p["b7d_4"])
    b7d = conv_bn_relu(y, p["b7d_5"])
    bp = conv_bn_relu(avg_pool_3x3_s1_p1(x), p["bp"])
    return jnp.concatenate([b1, b7, b7d, bp], axis=-1)


def inception_d(x, p):
    head = conv_bn_relu(x, p["head"])
    s0, _ = p["splits"]
    b3 = conv_bn_relu(head[..., :s0], p["b3_2"])
    y = head[..., s0:]
    y = conv_bn_relu(y, p["b7_2"])
    y = conv_bn_relu(y, p["b7_3"])
    b7 = conv_bn_relu(y, p["b7_4"])
    bp = max_pool_3x3_s2(x)
    return jnp.concatenate([b3, b7, bp], axis=-1)


def inception_e(x, p):
    head = conv_bn_relu(x, p["head"])
    s0, s1, _ = p["splits"]
    b1 = head[..., :s0]
    y = head[..., s0:s0 + s1]
    b3 = jnp.concatenate([conv_bn_relu(y, p["b3_2a"]),
                          conv_bn_relu(y, p["b3_2b"])], axis=-1)
    z = conv_bn_relu(head[..., s0 + s1:], p["b3d_2"])
    b3d = jnp.concatenate([conv_bn_relu(z, p["b3d_3a"]),
                           conv_bn_relu(z, p["b3d_3b"])], axis=-1)
    bp = conv_bn_relu(avg_pool_3x3_s1_p1(x), p["bp"])
    return jnp.concatenate([b1, b3, b3d, bp], axis=-1)


# ----------------------------------------------------------------------------
# WrapInception forward
# ----------------------------------------------------------------------------
def wrap_inception_forward(x_nchw, P):
    x = jnp.transpose(x_nchw.astype(jnp.float32), (0, 2, 3, 1))  # NHWC
    B, H, W, C = x.shape
    # ((x+1)/2 - mean)/std is folded into Conv2d_1a_3x3 (exact, see build_params).
    if H != 80 or W != 80:
        x = bilinear_resize_80(x)

    x = conv_bn_relu(x, P["Conv2d_1a_3x3"])
    x = conv_bn_relu(x, P["Conv2d_2a_3x3"])
    x = conv_bn_relu(x, P["Conv2d_2b_3x3"])
    x = max_pool_3x3_s2(x)
    x = conv_bn_relu(x, P["Conv2d_3b_1x1"])
    x = conv_bn_relu(x, P["Conv2d_4a_3x3"])
    x = max_pool_3x3_s2(x)
    x = inception_a(x, P["Mixed_5b"])
    x = inception_a(x, P["Mixed_5c"])
    x = inception_a(x, P["Mixed_5d"])
    x = inception_b(x, P["Mixed_6a"])
    x = inception_c(x, P["Mixed_6b"])
    x = inception_c(x, P["Mixed_6c"])
    x = inception_c(x, P["Mixed_6d"])
    x = inception_c(x, P["Mixed_6e"])
    x = inception_d(x, P["Mixed_7a"])
    x = inception_e(x, P["Mixed_7b"])
    x = inception_e(x, P["Mixed_7c"])
    pool = global_avg_pool(x)  # (B, 2048), matches adaptive_avg_pool2d(x,1).view(B,-1)
    return pool


if __name__ == "__main__":
    key = jax.random.PRNGKey(0)
    pkey, xkey = jax.random.split(key)
    params = build_params(pkey)
    # Small NCHW input, 3 channels required by the mean/std normalization.
    x = jax.random.uniform(xkey, (2, 3, 16, 16), jnp.float32,
                           minval=-1.0, maxval=1.0)
    out = wrap_inception_forward(x, params)
    out = jax.block_until_ready(out)
    assert out.shape == (2, 2048), out.shape
    assert bool(jnp.all(jnp.isfinite(out)))
    print("KERNEL_OK")
</pallas_src>

<mosaic_0001>
module attributes {stable_mosaic.version = 11 : i64} {
  func.func @_mm_kernel(%arg0: i32, %arg1: i32, %arg2: memref<256x27xbf16, #tpu.memory_space<vmem>>, %arg3: memref<27x128xbf16, #tpu.memory_space<vmem>>, %arg4: memref<1x128xf32, #tpu.memory_space<vmem>>, %arg5: memref<1x128xf32, #tpu.memory_space<vmem>>, %arg6: memref<256x128xf32, #tpu.memory_space<vmem>>) attributes {dimension_semantics = [#tpu.dimension_semantics<parallel>, #tpu.dimension_semantics<parallel>], iteration_bounds = array<i64: 12, 1>, scalar_prefetch = 0 : i64, scratch_operands = 0 : i64, tpu.core_type = #tpu.core_type<tc>, window_params = [{transform_indices = @transform_0, window_bounds = array<i64: 256, 27>}, {transform_indices = @transform_1, window_bounds = array<i64: 27, 128>}, {transform_indices = @transform_2, window_bounds = array<i64: 1, 128>}, {transform_indices = @transform_3, window_bounds = array<i64: 1, 128>}, {transform_indices = @transform_4, window_bounds = array<i64: 256, 128>}]} {
    %c0 = arith.constant 0 : index
    %c0_0 = arith.constant 0 : index
    %0 = vector.load %arg2[%c0, %c0_0] : memref<256x27xbf16, #tpu.memory_space<vmem>>, vector<256x27xbf16>
    %c0_1 = arith.constant 0 : index
    %c0_2 = arith.constant 0 : index
    %1 = vector.load %arg3[%c0_1, %c0_2] : memref<27x128xbf16, #tpu.memory_space<vmem>>, vector<27x128xbf16>
    %cst = arith.constant dense<0.000000e+00> : vector<256x128xf32>
    %2 = tpu.matmul %0, %1, %cst {dimension_numbers = #tpu.dot_dimension_numbers<[1], [0], [0], [1], [0, 0, 1, 1], [], []>} : vector<256x27xbf16>, vector<27x128xbf16>, vector<256x128xf32> -> vector<256x128xf32>
    %c0_3 = arith.constant 0 : index
    %c0_4 = arith.constant 0 : index
    %3 = vector.load %arg4[%c0_3, %c0_4] : memref<1x128xf32, #tpu.memory_space<vmem>>, vector<1x128xf32>
    %4 = vector.broadcast %3 : vector<1x128xf32> to vector<256x128xf32>
    %5 = arith.mulf %2, %4 : vector<256x128xf32>
    %c0_5 = arith.constant 0 : index
    %c0_6 = arith.constant 0 : index
    %6 = vector.load %arg5[%c0_5, %c0_6] : memref<1x128xf32, #tpu.memory_space<vmem>>, vector<1x128xf32>
    %7 = vector.broadcast %6 : vector<1x128xf32> to vector<256x128xf32>
    %8 = arith.addf %5, %7 : vector<256x128xf32>
    %cst_7 = arith.constant 0.000000e+00 : f32
    %9 = vector.broadcast %cst_7 : f32 to vector<256x128xf32>
    %10 = arith.maximumf %8, %9 : vector<256x128xf32>
    %c0_8 = arith.constant 0 : index
    %c0_9 = arith.constant 0 : index
    %11 = vector.load %arg6[%c0_8, %c0_9] : memref<256x128xf32, #tpu.memory_space<vmem>>, vector<256x128xf32>
    tpu.vector_store %arg6[%c0_8, %c0_9], %10 {strides = array<i32>} : memref<256x128xf32, #tpu.memory_space<vmem>>, vector<256x128xf32>,
    return
  }
  func.func @transform_0(%arg0: i32, %arg1: i32) -> (i32, i32) {
    %c0_i32 = arith.constant 0 : i32
    %c0_i32_0 = arith.constant 0 : i32
    return %arg0, %c0_i32 : i32, i32
  }
  func.func @transform_1(%arg0: i32, %arg1: i32) -> (i32, i32) {
    %c0_i32 = arith.constant 0 : i32
    %c0_i32_0 = arith.constant 0 : i32
    return %c0_i32, %arg1 : i32, i32
  }
  func.func @transform_2(%arg0: i32, %arg1: i32) -> (i32, i32) {
    %c0_i32 = arith.constant 0 : i32
    %c0_i32_0 = arith.constant 0 : i32
    return %c0_i32, %arg1 : i32, i32
  }
  func.func @transform_3(%arg0: i32, %arg1: i32) -> (i32, i32) {
    %c0_i32 = arith.constant 0 : i32
    %c0_i32_0 = arith.constant 0 : i32
    return %c0_i32, %arg1 : i32, i32
  }
  func.func @transform_4(%arg0: i32, %arg1: i32) -> (i32, i32) {
    %c0_i32 = arith.constant 0 : i32
    return %arg0, %arg1 : i32, i32
  }
}

</mosaic_0001>

<bundles_post_ra>
// kernel: tpu_custom_call.1
= control target key start
LH: loop header
LB: loop body
LE: loop exit
PB: predicated region body
PF: predicated region fallthrough
CT: control target
= control target key end

     0   :  { %s1662_s0 = inlined_call_operand.vmem [shape: bf16[3072,27], index: 0, kind: input, shape index: {}]   ;;  %s1663_s1 = inlined_call_operand.hbm [shape: bf16[27,128], index: 1, kind: input, shape index: {}]   ;;  %s1664_s2 = inlined_call_operand.hbm [shape: f32[1,128], index: 2, kind: input, shape index: {}]   ;;  %s1665_s3 = inlined_call_operand.hbm [shape: f32[1,128], index: 3, kind: input, shape index: {}]   ;;  %s1666_s4 = inlined_call_operand.hbm [shape: f32[3072,128], index: 4, kind: output, shape index: {}]  }
   0x1   :  { %1672 = sst [smem:[#allocation13_spill]] %s1664_s2 }
   0x2   :  { %9 = vsyncpa [#allocation3], 0 }
   0x3   :  { %10 = vsyncpa [#allocation6], 0 }
   0x4   :  { %11 = vsyncpa [#allocation4], 0 }
   0x5   :  { %13 = vsyncpa [#allocation4 + $0x1], 0  ;;  %s1314_s15 = smov 0   ;;  %s1316_s16 = smov 0  }
   0x6   :  { %s1318_s17 = smov 0   ;;  %s1320_s18 = smov 0  }
   0x7   :  { %s1322_s19 = smov 0   ;;  %s1324_s20 = smov 0  }
   0x8 LB: > { %s885_s21 = sadd.s32 4294967295, %s1278_s20   ;;  %s886_s22 = sadd.s32 4294967294, %s1278_s20   ;;  %s1278_s20 = sphi %s1324_s20, %s19_s20   ;;  %s1274_s19 = sphi %s1322_s19, %s1690_s19   ;;  %s1270_s18 = sphi %s1320_s18, %s1689_s18   ;;  %s1266_s17 = sphi %s1318_s17, %s1688_s17   ;;  %s1262_s16 = sphi %s1316_s16, %s1687_s16   ;;  %s1258_s15 = sphi %s1314_s15, %s1686_s15  }
   0x9   : > { %s31_s23 = sadd.s32 1, %s1274_s19  ;;  %s144_s24 = sadd.s32 1, %s1266_s17 }
   0xa   : > { %p33_p0 = scmp.ge.s32.totalorder %s31_s23, 12  ;;  %p154_p1 = scmp.ne.s32.totalorder %s1266_s17, %s1262_s16 }
   0xb   : > { %p155_p2 = scmp.eq.s32.totalorder %s885_s21, 11  ;;  %p160_p3 = scmp.ne.s32.totalorder %s1262_s16, %s1258_s15 }
   0xc   : > { %s1692_s23 = smov (%p33_p0, %s31_s23), 0  ;;  %p161_p5 = scmp.eq.s32.totalorder %s886_s22, 11 }
   0xd   : > { %1673 = sst [smem:[#allocation12_spill]] %s1692_s23  ;;  %p1354_p4 = por %p155_p2, %p154_p1 }
   0xe   : > { %s139_s26 = ssub.s32 %s1274_s19, %s1692_s23  ;;  %p887_p6 = scmp.ge.s32.totalorder %s1278_s20, 1 }
   0xf   : > { %s1674_s25 = scalar_select %p1354_p4, 1, 0 }
  0x10   : > { %p142_p7 = scmp.eq.s32.totalorder %s139_s26, 0  ;;  %p1361_p8 = por %p161_p5, %p160_p3 }
  0x11   : > { %p168_p9 = scmp.lt.s32.totalorder %s1278_s20, 13  ;;  %p1373_p11 = scmp.eq.s32.totalorder %s885_s21, 0 }
  0x12   : > { %s1675_s27 = scalar_select %p1361_p8, 1, 0 }
  0x13   : > { %s1367_s28 = scalar_select %p142_p7, %s1266_s17, %s144_s24  }
  0x14   : > { %p1369_p10 = pnand %p887_p6, %p168_p9  ;;  %s1280_s5 = smov [#allocation5]  }
  0x15   : > { %s1677_s30 = scalar_select %p1373_p11, 1, 0 }
  0x16   : > { %s1676_s29 = scalar_select %p1369_p10, 1, 0 }
  0x17   : > { %p1013_p12 = pneg %p1369_p10  ;;  %s198_s6 = sshll.u32 %s1280_s5, 4  ;;  %s199_s6 = int_to_ptr.vmem [resolvable:$true] %s198_s6 }
  0x18   : > { %s1281_s8 = smov [#allocation2]   ;;  %s1679_s2 = sld [smem:[#allocation13_spill]] }
  0x19   : > { %p1381_p13 = pnand %p1373_p11, %p1013_p12  ;;  %s182_s9 = sshll.u32 %s1281_s8, 4  ;;  %s1385_s9 = int_to_ptr.vmem [resolvable:$true] %s182_s9 }
  0x1b   : > { %p1395_p1 = pneg %p1381_p13 }
  0x1e   : > { %s1108_s12 = scalar_lea.hbm %s1679_s2, 16 }
  0x1f   : > { %p1109_p0 = scmp.ne.s32.totalorder %s1679_s2, %s1108_s12  ;;  %p1115_p5 = scmp.lt.u32.totalorder %s1108_s12, %s1679_s2 }
  0x21   : > { %p1111_p2 = pnand %p1395_p1, %p1109_p0 }
  0x23   : > { %p1112_p3 = pneg %p1111_p2 }
  0x25   : > { %p1117_p6 = pnand %p1115_p5, %p1112_p3 }
  0x27   : > { %1120 = shalt.err (!%p1117_p6)
}
  0x28   : > { %s1121_s26 = scalar_lea.vmem %s199_s6, 16  ;;  %s1128_s5 = scalar_lea.vmem %s199_s6, 32 }
  0x29   : > { %p1122_p7 = scmp.ne.s32.totalorder %s199_s6, %s1121_s26  ;;  %p1129_p8 = scmp.lt.s32.totalorder %s199_s6, %s199_s6 }
  0x2a   : > { %p1130_p4 = scmp.lt.s32.totalorder %s1128_s5, %s1121_s26 }
  0x2b   : > { %p1124_p9 = pnand %p1122_p7, %p1395_p1 }
  0x2c   : > { %p1131_p11 = por %p1130_p4, %p1129_p8 }
  0x2d   : > { %p1125_p12 = pneg %p1124_p9 }
  0x2f   : > { %p1132_p10 = pnand %p1131_p11, %p1125_p12 }
  0x31   : > { %1135 = shalt.err (!%p1132_p10)
}
  0x32   : > { %1019 = dma.hbm_to_vmem [thread:$0]  (!%p1381_p13), %s1679_s2, 16, %s199_s6, [#allocation6]  }
  0x33   : > { %s1136_s13 = scalar_lea.hbm %s1663_s1, 256 }
  0x34   : > { %p1137_p0 = scmp.ne.s32.totalorder %s1663_s1, %s1136_s13  ;;  %p1143_p8 = scmp.lt.u32.totalorder %s1136_s13, %s1663_s1 }
  0x36   : > { %p1139_p2 = pnand %p1137_p0, %p1395_p1 }
  0x38   : > { %p1140_p4 = pneg %p1139_p2 }
  0x3a   : > { %p1145_p10 = pnand %p1143_p8, %p1140_p4 }
  0x3c   : > { %1148 = shalt.err (!%p1145_p10)
}
  0x3d   : > { %s1149_s6 = scalar_lea.vmem %s1385_s9, 256  ;;  %p1157_p6 = scmp.lt.s32.totalorder %s1385_s9, %s1385_s9 }
  0x3e   : > { %p1150_p11 = scmp.ne.s32.totalorder %s1385_s9, %s1149_s6  ;;  %p1158_p7 = scmp.lt.s32.totalorder %s1149_s6, %s1149_s6 }
  0x40   : > { %p1152_p3 = pnand %p1150_p11, %p1395_p1  ;;  %p1159_p9 = por %p1158_p7, %p1157_p6 }
  0x42   : > { %p1153_p5 = pneg %p1152_p3 }
  0x44   : > { %p1160_p12 = pnand %p1159_p9, %p1153_p5 }
  0x46   : > { %1163 = shalt.err (!%p1160_p12)
}
  0x47   : > { %s1282_s5 = smov 64   ;;  %s1283_s8 = smov 4  }
  0x48   : > { %1016 = dma.hbm_to_vmem [thread:$0]  (!%p1381_p13), %s1663_s1, 256, %s1385_s9, [#allocation3], %s1282_s5, %s1282_s5, %s1283_s8  }
  0x49   : > { %s1284_s12 = smov [#allocation7]   ;;  %s1164_s24 = scalar_lea.hbm %s1665_s3, 16 }
  0x4a   : > { %s211_s13 = sshll.u32 %s1284_s12, 4  ;;  %p1165_p0 = scmp.ne.s32.totalorder %s1665_s3, %s1164_s24  ;;  %s212_s13 = int_to_ptr.vmem [resolvable:$true] %s211_s13 }
  0x4b   : > { %p1171_p8 = scmp.lt.u32.totalorder %s1164_s24, %s1665_s3 }
  0x4c   : > { %p1167_p2 = pnand %p1165_p0, %p1395_p1 }
  0x4e   : > { %p1168_p4 = pneg %p1167_p2 }
  0x50   : > { %p1173_p10 = pnand %p1171_p8, %p1168_p4 }
  0x52   : > { %1176 = shalt.err (!%p1173_p10)
}
  0x53   : > { %s1177_s9 = scalar_lea.vmem %s212_s13, 16  ;;  %s1184_s5 = scalar_lea.vmem %s212_s13, 32 }
  0x54   : > { %p1178_p11 = scmp.ne.s32.totalorder %s212_s13, %s1177_s9  ;;  %p1185_p6 = scmp.lt.s32.totalorder %s212_s13, %s212_s13 }
  0x55   : > { %p1186_p7 = scmp.lt.s32.totalorder %s1184_s5, %s1177_s9 }
  0x56   : > { %p1180_p3 = pnand %p1178_p11, %p1395_p1 }
  0x57   : > { %p1187_p9 = por %p1186_p7, %p1185_p6 }
  0x58   : > { %p1181_p5 = pneg %p1180_p3 }
  0x5a   : > { %p1188_p12 = pnand %p1187_p9, %p1181_p5 }
  0x5c   : > { %1191 = shalt.err (!%p1188_p12)
}
  0x5d   : > { %1022 = dma.hbm_to_vmem [thread:$0]  (!%p1381_p13), %s1665_s3, 16, %s212_s13, [#allocation6]  }
  0x5e   : > { %p1681_p0 = scmp.ne.s32.totalorder %s1676_s29, 0 }
  0x5f   : > { %p1682_p2 = scmp.ne.s32.totalorder (!%p1681_p0), %s1677_s30, 0 }
  0x60   : > { %233 = sbr.rel (%p1681_p0) target bundleno = 377 (0x179), region = 36 }
  0x67   : > { %1245 = dma.done.wait (%p1682_p2), [#allocation3], 256  }
  0x68   : > { %1247 = vsyncadd (%p1682_p2), [#allocation3], 4294967040 }
  0x69   : > { %1249 = dma.done.wait (%p1682_p2), [#allocation6], 32  }
  0x6a   : > { %1251 = vsyncadd (%p1682_p2), [#allocation6], 4294967264  ;;  %s897_s2 = sshll.u32 %s1270_s18, 5  ;;  %vm451_vm0 = vcmask 1044480   ;;  %vm452_vm1 = vcmask 1045504   ;;  %v1285_v0 = vmov 65535  }
  0x6b   : > { %p268_p1 = scmp.lt.s32.totalorder %s897_s2, 383  ;;  %v453_v1 = vsel %vm451_vm0, 4294967295, %v1285_v0  ;;  %vm402_vm2 = vcmask 220160   ;;  %v1090_v2 = vld [vmem:[#allocation2] sm:$0xff]   ;;  %v1091_v4 = vld [vmem:[#allocation2 + $0x8] sm:$0x3f]  }
  0x6c   : > { %v454_v3 = vsel %vm452_vm1, %v453_v1, 0  ;;  %959 = vmatprep.subr.bf16.mxu0 %v1090_v2  ;;  %995 = vmatprep.subr.bf16.mxu1 %v1090_v2  ;;  %s264_s30 = sand.u32 1, %s1262_s16   ;;  %v1501_v22 = vld [vmem:[#allocation5] ss:$0 sm:$0xff]  ;;  %v1503_v24 = vld [vmem:[#allocation7] ss:$0 sm:$0xff] }
  0x6d   : > { %s1694_s2 = smov (!%p268_p1, %s897_s2), 383  ;;  %960 = vmatpush3.bf16.msra.mxu0 %v1090_v2  ;;  %997 = vmatpush3.bf16.msra.mxu1 %v1090_v2  ;;  %v456_v6 = vand.u32 %v1091_v4, %v454_v3  ;;  %s896_s11 = sshll.u32 %s264_s30, 8 }
  0x6e   : > { %s898_s23 = sshll.u32 %s1694_s2, 2  ;;  %s1523_s12 = scalar_lea.vmem [#allocation8], %s896_s11 }
  0x6f   : > { %s1466_s21 = scalar_lea.vmem %s1662_s0, %s898_s23  ;;  %961 = vmatprep.subr.bf16.mxu0 %v456_v6  ;;  %996 = vmatprep.subr.bf16.mxu1 %v456_v6  ;;  %s940_s13 = sshll.u32 %s1270_s18, 12 }
  0x70   : > { %v1092_v5 = vld [vmem:[%s1466_s21] sm:$0xff]   ;;  %v1094_v8 = vld [vmem:[%s1466_s21 + $0x8] sm:$0xff]   ;;  %v1096_v10 = vld [vmem:[%s1466_s21 + $0x10] sm:$0xff]   ;;  %s776_s14 = sshll.u32 %s1523_s12, 4  ;;  %s1604_s24 = scalar_lea.hbm %s1666_s4, %s940_s13  ;;  %s1606_s14 = int_to_ptr.vmem [resolvable:$true] %s776_s14 }
  0x71   : > { %v1093_v7 = vld [vmem:[%s1466_s21 + $0x40] sm:$0xff]   ;;  %963 = vmatprep.mubr.msk.bf16.mxu0 %vm402_vm2, %v1092_v5  ;;  %v1095_v9 = vld [vmem:[%s1466_s21 + $0x48] sm:$0xff]   ;;  %962 = vmatpush3.bf16.msra.mxu0 %v456_v6  ;;  %v1097_v11 = vld [vmem:[%s1466_s21 + $0x50] sm:$0xff]   ;;  %s1616_s26 = scalar_lea.sflag [#allocation4], %s264_s30  ;;  %s1192_s6 = scalar_lea.vmem %s1606_s14, 4096 }
  0x72   : > { %979 = vmatprep.mubr.msk.bf16.mxu1 %vm402_vm2, %v1093_v7  ;;  %998 = vmatpush3.bf16.msra.mxu1 %v456_v6  ;;  %v1098_v12 = vld [vmem:[%s1466_s21 + $0x18] sm:$0xff]   ;;  %v1100_v14 = vld [vmem:[%s1466_s21 + $0x20] sm:$0xff]   ;;  %v1102_v16 = vld [vmem:[%s1466_s21 + $0x28] sm:$0xff]   ;;  %p1193_p13 = scmp.ne.s32.totalorder %s1606_s14, %s1192_s6  ;;  %p1683_p4 = scmp.ne.s32.totalorder %s1674_s25, 0 }
  0x73   : > { %v1099_v13 = vld [vmem:[%s1466_s21 + $0x58] sm:$0xff]   ;;  %v1101_v15 = vld [vmem:[%s1466_s21 + $0x60] sm:$0xff]   ;;  %v1103_v17 = vld [vmem:[%s1466_s21 + $0x68] sm:$0xff]   ;;  %s1286_s9 = smov [#allocation8]  }
  0x74   : > { %964 = vmatmul.mubr.msk.bf16.vlgmr.msra.gmra.mrb[0].mxu0 %vm402_vm2, %v1094_v8  ;;  %v1104_v18 = vld [vmem:[%s1466_s21 + $0x30] sm:$0xff]   ;;  %v1106_v20 = vld [vmem:[%s1466_s21 + $0x38] sm:$0xff]   ;;  %p1194_p8 = pnand %p1193_p13, %p1683_p4  ;;  %s1196_s5 = sshll.u32 %s1286_s9, 4  ;;  %s1197_s5 = int_to_ptr.vmem [resolvable:$false] %s1196_s5 }
  0x75   : > { %980 = vmatmul.mubr.msk.bf16.vlgmr.msra.gmra.mrb[0].mxu1 %vm402_vm2, %v1095_v9  ;;  %967 = vmatprep.mubr.msk.bf16.mxu0 %vm402_vm2, %v1096_v10  ;;  %v1105_v19 = vld [vmem:[%s1466_s21 + $0x70] sm:$0xff]   ;;  %v1107_v21 = vld [vmem:[%s1466_s21 + $0x78] sm:$0xff]   ;;  %s1198_s8 = scalar_lea.vmem %s1197_s5, 8192  ;;  %p1199_p11 = scmp.lt.s32.totalorder %s1606_s14, %s1197_s5 }
  0x76   : > { %983 = vmatprep.mubr.msk.bf16.mxu1 %vm402_vm2, %v1097_v11  ;;  %p1195_p10 = pneg %p1194_p8  ;;  %p1200_p3 = scmp.lt.s32.totalorder %s1198_s8, %s1192_s6 }
  0x78   : > { %p1201_p5 = por %p1200_p3, %p1199_p11 }
  0x7a   : > { %p1202_p6 = pnand %p1201_p5, %p1195_p10 }
  0x7c   : > { %968 = vmatmul.mubr.msk.bf16.gmra.mrb[4].mxu0 %vm402_vm2, %v1098_v12 }
  0x7d   : > { %984 = vmatmul.mubr.msk.bf16.gmra.mrb[4].mxu1 %vm402_vm2, %v1099_v13  ;;  %971 = vmatprep.mubr.msk.bf16.mxu0 %vm402_vm2, %v1100_v14 }
  0x7e   : > { %987 = vmatprep.mubr.msk.bf16.mxu1 %vm402_vm2, %v1101_v15 }
  0x84   : > { %972 = vmatmul.mubr.msk.bf16.gmra.mrb[8].mxu0 %vm402_vm2, %v1102_v16 }
  0x85   : > { %988 = vmatmul.mubr.msk.bf16.gmra.mrb[8].mxu1 %vm402_vm2, %v1103_v17  ;;  %975 = vmatprep.mubr.msk.bf16.mxu0 %vm402_vm2, %v1104_v18 }
  0x86   : > { %991 = vmatprep.mubr.msk.bf16.mxu1 %vm402_vm2, %v1105_v19 }
  0x8c   : > { %976 = vmatmul.mubr.msk.bf16.gmra.mrb[12].mxu0 %vm402_vm2, %v1106_v20 }
  0x8d   : > { %992 = vmatmul.mubr.msk.bf16.gmra.mrb[12].mxu1 %vm402_vm2, %v1107_v21 }
 0x147   : > { %v965_v23 = vpop.f32.mrb[0].mxu0 }
 0x148   : > { %v981_v25 = vpop.f32.mrb[0].mxu1  ;;  %v628_v26 = vmul.f32 %v965_v23, %v1501_v22  ;;  %v492_v28 = vpop.f32.mrb[1].mxu0 }
 0x149   : > { %v644_v27 = vmul.f32 %v981_v25, %v1501_v22  ;;  %v556_v29 = vpop.f32.mrb[1].mxu1  ;;  %v626_v30 = vmul.f32 %v1501_v22, %v492_v28  ;;  %v966_v32 = vpop.f32.mrb[2].mxu0 }
 0x14a   : > { %v642_v31 = vmul.f32 %v1501_v22, %v556_v29  ;;  %v982_v33 = vpop.f32.mrb[2].mxu1  ;;  %v667_v34 = vadd.f32 %v1503_v24, %v628_v26  ;;  %v629_v36 = vmul.f32 %v966_v32, %v1501_v22  ;;  %v495_v38 = vpop.f32.mrb[3].mxu0 }
 0x14b   : > { %v683_v35 = vadd.f32 %v1503_v24, %v644_v27  ;;  %v645_v37 = vmul.f32 %v982_v33, %v1501_v22  ;;  %v559_v39 = vpop.f32.mrb[3].mxu1  ;;  %v665_v40 = vadd.f32 %v1503_v24, %v626_v30  ;;  %v627_v42 = vmul.f32 %v1501_v22, %v495_v38 }
 0x14c   : > { %v681_v41 = vadd.f32 %v1503_v24, %v642_v31  ;;  %v643_v43 = vmul.f32 %v1501_v22, %v559_v39  ;;  %v699_v44 = vmax.f32 %v667_v34, 0.0  ;;  %v668_v46 = vadd.f32 %v1503_v24, %v629_v36 }
 0x14d   : > { %v715_v45 = vmax.f32 %v683_v35, 0.0  ;;  %v684_v47 = vadd.f32 %v1503_v24, %v645_v37  ;;  %v697_v48 = vmax.f32 %v665_v40, 0.0  ;;  %v666_v50 = vadd.f32 %v1503_v24, %v627_v42 }
 0x14e   : > { %v713_v49 = vmax.f32 %v681_v41, 0.0  ;;  %v682_v51 = vadd.f32 %v1503_v24, %v643_v43  ;;  %731 = vst [vmem:[%s1523_s12 + $0x10] sm:$0xff] %v699_v44  ;;  %v700_v52 = vmax.f32 %v668_v46, 0.0 }
 0x14f   : > { %747 = vst [vmem:[%s1523_s12 + $0x90] sm:$0xff] %v715_v45  ;;  %v716_v53 = vmax.f32 %v684_v47, 0.0  ;;  %729 = vst [vmem:[%s1523_s12] sm:$0xff] %v697_v48  ;;  %v698_v54 = vmax.f32 %v666_v50, 0.0  ;;  %v969_v56 = vpop.f32.mrb[4].mxu0 }
 0x150   : > { %745 = vst [vmem:[%s1523_s12 + $0x80] sm:$0xff] %v713_v49  ;;  %v714_v55 = vmax.f32 %v682_v51, 0.0  ;;  %v985_v57 = vpop.f32.mrb[4].mxu1  ;;  %732 = vst [vmem:[%s1523_s12 + $0x18] sm:$0xff] %v700_v52  ;;  %v632_v58 = vmul.f32 %v969_v56, %v1501_v22  ;;  %v508_v60 = vpop.f32.mrb[5].mxu0 }
 0x151   : > { %748 = vst [vmem:[%s1523_s12 + $0x98] sm:$0xff] %v716_v53  ;;  %v648_v59 = vmul.f32 %v985_v57, %v1501_v22  ;;  %v572_v61 = vpop.f32.mrb[5].mxu1  ;;  %730 = vst [vmem:[%s1523_s12 + $0x8] sm:$0xff] %v698_v54  ;;  %v630_v62 = vmul.f32 %v1501_v22, %v508_v60  ;;  %v970_v0 = vpop.f32.mrb[6].mxu0 }
 0x152   : > { %746 = vst [vmem:[%s1523_s12 + $0x88] sm:$0xff] %v714_v55  ;;  %v646_v63 = vmul.f32 %v1501_v22, %v572_v61  ;;  %v986_v1 = vpop.f32.mrb[6].mxu1  ;;  %v671_v2 = vadd.f32 %v1503_v24, %v632_v58  ;;  %v633_v4 = vmul.f32 %v970_v0, %v1501_v22  ;;  %v511_v6 = vpop.f32.mrb[7].mxu0 }
 0x153   : > { %v687_v3 = vadd.f32 %v1503_v24, %v648_v59  ;;  %v649_v5 = vmul.f32 %v986_v1, %v1501_v22  ;;  %v575_v7 = vpop.f32.mrb[7].mxu1  ;;  %v669_v8 = vadd.f32 %v1503_v24, %v630_v62  ;;  %v631_v10 = vmul.f32 %v1501_v22, %v511_v6 }
 0x154   : > { %v685_v9 = vadd.f32 %v1503_v24, %v646_v63  ;;  %v647_v11 = vmul.f32 %v1501_v22, %v575_v7  ;;  %v703_v12 = vmax.f32 %v671_v2, 0.0  ;;  %v672_v14 = vadd.f32 %v1503_v24, %v633_v4 }
 0x155   : > { %v719_v13 = vmax.f32 %v687_v3, 0.0  ;;  %v688_v15 = vadd.f32 %v1503_v24, %v649_v5  ;;  %v701_v16 = vmax.f32 %v669_v8, 0.0  ;;  %v670_v18 = vadd.f32 %v1503_v24, %v631_v10 }
 0x156   : > { %v717_v17 = vmax.f32 %v685_v9, 0.0  ;;  %v686_v19 = vadd.f32 %v1503_v24, %v647_v11  ;;  %735 = vst [vmem:[%s1523_s12 + $0x30] sm:$0xff] %v703_v12  ;;  %v704_v20 = vmax.f32 %v672_v14, 0.0 }
 0x157   : > { %751 = vst [vmem:[%s1523_s12 + $0xb0] sm:$0xff] %v719_v13  ;;  %v720_v21 = vmax.f32 %v688_v15, 0.0  ;;  %733 = vst [vmem:[%s1523_s12 + $0x20] sm:$0xff] %v701_v16  ;;  %v702_v23 = vmax.f32 %v670_v18, 0.0  ;;  %v973_v26 = vpop.f32.mrb[8].mxu0 }
 0x158   : > { %749 = vst [vmem:[%s1523_s12 + $0xa0] sm:$0xff] %v717_v17  ;;  %v718_v25 = vmax.f32 %v686_v19, 0.0  ;;  %v989_v27 = vpop.f32.mrb[8].mxu1  ;;  %736 = vst [vmem:[%s1523_s12 + $0x38] sm:$0xff] %v704_v20  ;;  %v636_v28 = vmul.f32 %v973_v26, %v1501_v22  ;;  %v524_v30 = vpop.f32.mrb[9].mxu0 }
 0x159   : > { %752 = vst [vmem:[%s1523_s12 + $0xb8] sm:$0xff] %v720_v21  ;;  %v652_v29 = vmul.f32 %v989_v27, %v1501_v22  ;;  %v588_v31 = vpop.f32.mrb[9].mxu1  ;;  %734 = vst [vmem:[%s1523_s12 + $0x28] sm:$0xff] %v702_v23  ;;  %v634_v32 = vmul.f32 %v1501_v22, %v524_v30  ;;  %v974_v34 = vpop.f32.mrb[10].mxu0 }
 0x15a   : > { %750 = vst [vmem:[%s1523_s12 + $0xa8] sm:$0xff] %v718_v25  ;;  %v650_v33 = vmul.f32 %v1501_v22, %v588_v31  ;;  %v990_v35 = vpop.f32.mrb[10].mxu1  ;;  %v675_v36 = vadd.f32 %v1503_v24, %v636_v28  ;;  %v637_v38 = vmul.f32 %v974_v34, %v1501_v22  ;;  %v527_v40 = vpop.f32.mrb[11].mxu0 }
 0x15b   : > { %v691_v37 = vadd.f32 %v1503_v24, %v652_v29  ;;  %v653_v39 = vmul.f32 %v990_v35, %v1501_v22  ;;  %v591_v41 = vpop.f32.mrb[11].mxu1  ;;  %v673_v42 = vadd.f32 %v1503_v24, %v634_v32  ;;  %v635_v44 = vmul.f32 %v1501_v22, %v527_v40 }
 0x15c   : > { %v689_v43 = vadd.f32 %v1503_v24, %v650_v33  ;;  %v651_v45 = vmul.f32 %v1501_v22, %v591_v41  ;;  %v707_v46 = vmax.f32 %v675_v36, 0.0  ;;  %v676_v48 = vadd.f32 %v1503_v24, %v637_v38 }
 0x15d   : > { %v723_v47 = vmax.f32 %v691_v37, 0.0  ;;  %v692_v49 = vadd.f32 %v1503_v24, %v653_v39  ;;  %v705_v50 = vmax.f32 %v673_v42, 0.0  ;;  %v674_v52 = vadd.f32 %v1503_v24, %v635_v44 }
 0x15e   : > { %v721_v51 = vmax.f32 %v689_v43, 0.0  ;;  %v690_v53 = vadd.f32 %v1503_v24, %v651_v45  ;;  %739 = vst [vmem:[%s1523_s12 + $0x50] sm:$0xff] %v707_v46  ;;  %v708_v54 = vmax.f32 %v676_v48, 0.0 }
 0x15f   : > { %755 = vst [vmem:[%s1523_s12 + $0xd0] sm:$0xff] %v723_v47  ;;  %v724_v55 = vmax.f32 %v692_v49, 0.0  ;;  %737 = vst [vmem:[%s1523_s12 + $0x40] sm:$0xff] %v705_v50  ;;  %v706_v56 = vmax.f32 %v674_v52, 0.0  ;;  %v977_v58 = vpop.f32.mrb[12].mxu0 }
 0x160   : > { %753 = vst [vmem:[%s1523_s12 + $0xc0] sm:$0xff] %v721_v51  ;;  %v722_v57 = vmax.f32 %v690_v53, 0.0  ;;  %v993_v59 = vpop.f32.mrb[12].mxu1  ;;  %740 = vst [vmem:[%s1523_s12 + $0x58] sm:$0xff] %v708_v54  ;;  %v640_v60 = vmul.f32 %v977_v58, %v1501_v22  ;;  %v540_v62 = vpop.f32.mrb[13].mxu0 }
 0x161   : > { %756 = vst [vmem:[%s1523_s12 + $0xd8] sm:$0xff] %v724_v55  ;;  %v656_v61 = vmul.f32 %v993_v59, %v1501_v22  ;;  %v604_v63 = vpop.f32.mrb[13].mxu1  ;;  %738 = vst [vmem:[%s1523_s12 + $0x48] sm:$0xff] %v706_v56  ;;  %v638_v0 = vmul.f32 %v1501_v22, %v540_v62  ;;  %v978_v2 = vpop.f32.mrb[14].mxu0 }
 0x162   : > { %754 = vst [vmem:[%s1523_s12 + $0xc8] sm:$0xff] %v722_v57  ;;  %v654_v1 = vmul.f32 %v1501_v22, %v604_v63  ;;  %v994_v3 = vpop.f32.mrb[14].mxu1  ;;  %v679_v4 = vadd.f32 %v1503_v24, %v640_v60  ;;  %v641_v6 = vmul.f32 %v978_v2, %v1501_v22  ;;  %v543_v8 = vpop.f32.mrb[15].mxu0 }
 0x163   : > { %v695_v5 = vadd.f32 %v1503_v24, %v656_v61  ;;  %v657_v7 = vmul.f32 %v994_v3, %v1501_v22  ;;  %v607_v9 = vpop.f32.mrb[15].mxu1  ;;  %v677_v10 = vadd.f32 %v1503_v24, %v638_v0  ;;  %v639_v12 = vmul.f32 %v1501_v22, %v543_v8 }
 0x164   : > { %v693_v11 = vadd.f32 %v1503_v24, %v654_v1  ;;  %v655_v13 = vmul.f32 %v1501_v22, %v607_v9  ;;  %v711_v14 = vmax.f32 %v679_v4, 0.0  ;;  %v680_v16 = vadd.f32 %v1503_v24, %v641_v6 }
 0x165   : > { %v727_v15 = vmax.f32 %v695_v5, 0.0  ;;  %v696_v17 = vadd.f32 %v1503_v24, %v657_v7  ;;  %v709_v18 = vmax.f32 %v677_v10, 0.0  ;;  %v678_v20 = vadd.f32 %v1503_v24, %v639_v12 }
 0x166   : > { %v725_v19 = vmax.f32 %v693_v11, 0.0  ;;  %v694_v22 = vadd.f32 %v1503_v24, %v655_v13  ;;  %743 = vst [vmem:[%s1523_s12 + $0x70] sm:$0xff] %v711_v14  ;;  %v712_v21 = vmax.f32 %v680_v16, 0.0 }
 0x167   : > { %759 = vst [vmem:[%s1523_s12 + $0xf0] sm:$0xff] %v727_v15  ;;  %v728_v23 = vmax.f32 %v696_v17, 0.0  ;;  %741 = vst [vmem:[%s1523_s12 + $0x60] sm:$0xff] %v709_v18  ;;  %v710_v25 = vmax.f32 %v678_v20, 0.0 }
 0x168   : > { %757 = vst [vmem:[%s1523_s12 + $0xe0] sm:$0xff] %v725_v19  ;;  %v726_v26 = vmax.f32 %v694_v22, 0.0  ;;  %744 = vst [vmem:[%s1523_s12 + $0x78] sm:$0xff] %v712_v21 }
 0x169   : > { %760 = vst [vmem:[%s1523_s12 + $0xf8] sm:$0xff] %v728_v23  ;;  %742 = vst [vmem:[%s1523_s12 + $0x68] sm:$0xff] %v710_v25 }
 0x16a   : > { %758 = vst [vmem:[%s1523_s12 + $0xe8] sm:$0xff] %v726_v26 }
 0x16b   : > { %1205 = shalt.err (!%p1202_p6)
}
 0x16c   : > { %s1206_s10 = scalar_lea.hbm %s1604_s24, 4096  ;;  %s1210_s29 = scalar_lea.hbm %s1666_s4, 49152 }
 0x16d   : > { %p1207_p7 = scmp.ne.s32.totalorder %s1604_s24, %s1206_s10  ;;  %p1211_p0 = scmp.lt.u32.totalorder %s1604_s24, %s1666_s4 }
 0x16e   : > { %p1212_p2 = scmp.lt.u32.totalorder %s1210_s29, %s1206_s10  ;;  %p1214_p13 = scmp.lt.u32.totalorder %s1206_s10, %s1604_s24 }
 0x16f   : > { %p1208_p9 = pnand %p1207_p7, %p1683_p4 }
 0x170   : > { %p1213_p1 = por %p1212_p2, %p1211_p0 }
 0x171   : > { %p1209_p12 = pneg %p1208_p9 }
 0x172   : > { %p1215_p8 = por %p1214_p13, %p1213_p1 }
 0x174   : > { %p1216_p10 = pnand %p1215_p8, %p1209_p12 }
 0x176   : > { %1219 = shalt.err (!%p1216_p10)
}
 0x177   : > { %s1287_s30 = smov 128   ;;  %s1288_s11 = smov 8  }
 0x178   : > { %1011 = dma.vmem_to_hbm [thread:$0]  (%p1683_p4), %s1606_s14, 4096, %s1604_s24, %s1616_s26, %s1287_s30, %s1287_s30, %s1288_s11  }
 0x179 PF: > { %p1033_p11 = scmp.ge.s32.totalorder %s1278_s20, 2  ;;  %s791_s12 = sand.u32 1, %s1258_s15  }
 0x17a   : > { %p1684_p3 = scmp.ne.s32.totalorder %s1675_s27, 0  ;;  %s792_s13 = scalar_lea.sflag [#allocation4], %s791_s12 }
 0x17c   : > { %p1024_p5 = pnand %p1033_p11, %p1684_p3 }
 0x17e   : > { %1253 = dma.done.wait (!%p1024_p5), %s792_s13, 4096  }
 0x17f   : > { %1255 = vsyncadd (!%p1024_p5), %s792_s13, 4294963200  ;;  %s19_s20 = sadd.s32 1, %s1278_s20   ;;  %s1685_s25 = sld [smem:[#allocation12_spill]] }
 0x180   : > { %p16_p6 = scmp.ge.s32.totalorder %s19_s20, 14   ;;  %s1686_s15 = smov %s1262_s16 }
 0x181   : > { %s1687_s16 = smov %s1266_s17  ;;  %s1688_s17 = smov %s1367_s28 }
 0x182   : > { %s1689_s18 = smov %s1274_s19  ;;  %18 = sbr.rel (!%p16_p6) target bundleno = 8 (0x8), region = 87 }
 0x185   : > { %s1690_s19 = smov %s1685_s25 }
 0x189   :  { %797 = vsyncpa [#allocation3], 1 }
 0x18a   :  { %799 = vsyncpa [#allocation3 + $0x1], 1 }
 0x18b   :  { %800 = vsyncpa [#allocation6], 1 }
 0x18c   :  { %801 = vsyncpa [#allocation4], 1 }
 0x18d   :  { %803 = vsyncpa [#allocation4 + $0x1], 1 }

</bundles_post_ra>
